<compile_context>
chip_gen: v5e
topology: v5e:2x2
jax: 0.10.0
libtpu: 0.0.40
codegen_flags: <defaults>
</compile_context>

<pallas_src>
import functools
import math

import jax
import jax.numpy as jnp
from jax.experimental import pallas as pl
from jax.experimental.pallas import tpu as pltpu


def _pick_tile(dim, target):
    """Largest divisor of `dim` that is <= target, preferring sublane-aligned
    (multiple of 8) tiles; falls back to any divisor, or the full dim."""
    if dim <= target:
        return dim
    for t in range(min(dim, target), 0, -1):
        if dim % t == 0 and (t % 8 == 0 or t == dim):
            return t
    for t in range(min(dim, target), 0, -1):
        if dim % t == 0:
            return t
    return dim


def sdpa_kernel(q_ref, k_ref, v_ref, mask_ref, ctx_ref, attn_ref, *, scale):
    # q: [BN, TQ, Dk]   k, v: [BN, Lk, Dk]   mask: [BN, 1 or TQ, Lk]
    # Fold 1/sqrt(d_k) into Q once, then feed the MXU bf16 operands with f32
    # accumulation (softmax math stays f32).
    q = (q_ref[...].astype(jnp.float32) * scale).astype(jnp.bfloat16)
    k = k_ref[...].astype(jnp.bfloat16)

    s = jnp.einsum("nqd,nkd->nqk", q, k, preferred_element_type=jnp.float32)
    s = s + mask_ref[...].astype(jnp.float32)      # broadcasts over TQ if mask has Lq=1

    # Numerically-stable softmax along the key axis (matches nn.Softmax(dim=-1)).
    m = jnp.max(s, axis=-1, keepdims=True)
    p = jnp.exp(s - m)
    denom = jnp.sum(p, axis=-1, keepdims=True)
    attn = p * (1.0 / denom)                       # exact: attn is a returned output

    v = v_ref[...].astype(jnp.bfloat16)
    ctx = jnp.einsum("nqk,nkd->nqd", attn.astype(jnp.bfloat16), v,
                     preferred_element_type=jnp.float32)

    ctx_ref[...] = ctx.astype(ctx_ref.dtype)
    attn_ref[...] = attn.astype(attn_ref.dtype)


def scaled_dot_product_attention(Q, K, V, attn_mask=None, *, d_k=None,
                                 bn_target=8, tq_target=256):
    """Pallas port of ScaledDotProductAttention.forward -> (context, attn)."""
    B, H, Lq, Dk = Q.shape
    Lk = K.shape[-2]
    if d_k is None:
        d_k = Dk
    N = B * H
    out_dtype = Q.dtype

    # Fold batch & heads into one leading axis (free layout plumbing).
    q = Q.reshape(N, Lq, Dk)
    k = K.reshape(N, Lk, Dk)
    v = V.reshape(N, Lk, Dk)

    # Mask: expand only over (B, H) to the folded N axis; keep the query axis
    # un-broadcast if it is 1 (padding masks) — the full [N, Lq, Lk] tensor is
    # never materialized in HBM.
    if attn_mask is None:
        mask = jnp.zeros((N, 1, Lk), jnp.float32)
    else:
        m = jnp.asarray(attn_mask, jnp.float32)
        if m.ndim < 4:
            m = m.reshape((1,) * (4 - m.ndim) + m.shape)
        m = jnp.broadcast_to(m, (B, H) + m.shape[-2:])
        mask = m.reshape(N, m.shape[-2], Lk)
    Lq_m = mask.shape[1]

    # Tile sizes: >=8 heads per step where possible (amortize per-step
    # overhead / fill the MXU); query tiles capped so per-step VMEM stays
    # well under the scoped default on every generation (incl. v7x 64 MiB).
    BN = _pick_tile(N, bn_target)
    TQ = _pick_tile(Lq, tq_target)
    grid = (N // BN, Lq // TQ)

    q_spec = pl.BlockSpec((BN, TQ, Dk), lambda i, j: (i, j, 0))
    kv_spec = pl.BlockSpec((BN, Lk, Dk), lambda i, j: (i, 0, 0))
    if Lq_m == 1:
        mask_spec = pl.BlockSpec((BN, 1, Lk), lambda i, j: (i, 0, 0))
    else:
        mask_spec = pl.BlockSpec((BN, TQ, Lk), lambda i, j: (i, j, 0))
    ctx_spec = pl.BlockSpec((BN, TQ, Dk), lambda i, j: (i, j, 0))
    attn_spec = pl.BlockSpec((BN, TQ, Lk), lambda i, j: (i, j, 0))

    kern = functools.partial(sdpa_kernel, scale=1.0 / math.sqrt(d_k))
    ctx, attn = pl.pallas_call(
        kern,
        out_shape=(
            jax.ShapeDtypeStruct((N, Lq, Dk), out_dtype),
            jax.ShapeDtypeStruct((N, Lq, Lk), jnp.float32),
        ),
        grid=grid,
        in_specs=[q_spec, kv_spec, kv_spec, mask_spec],
        out_specs=(ctx_spec, attn_spec),
        compiler_params=pltpu.CompilerParams(
            # Both grid axes are independent -> shard across TCs on v7x.
            dimension_semantics=("parallel", "parallel")),
    )(q, k, v, mask)

    # TODO(synk): for very long Lk the returned full attn matrix (and its
    # O(Lq*Lk) score block) becomes the dominant cost; a flash-style online
    # softmax variant that drops attn would be the next step.
    return ctx.reshape(B, H, Lq, Dk), attn.reshape(B, H, Lq, Lk)


if __name__ == "__main__":
    B, H, Lq, Lk, Dk = 2, 6, 8, 8, 32

    key = jax.random.PRNGKey(0)
    kq, kk, kv = jax.random.split(key, 3)
    Q = jax.random.normal(kq, (B, H, Lq, Dk), jnp.float32)
    K = jax.random.normal(kk, (B, H, Lk, Dk), jnp.float32)
    V = jax.random.normal(kv, (B, H, Lk, Dk), jnp.float32)

    # Additive padding mask (broadcastable, as the PyTorch module expects):
    # last two key positions of every sequence are masked out with -10000.
    key_keep = (jnp.arange(Lk) < Lk - 2).astype(jnp.float32)          # [Lk]
    attn_mask = ((1.0 - key_keep) * -10000.0)[None, None, None, :]    # [1,1,1,Lk]
    attn_mask = jnp.broadcast_to(attn_mask, (B, 1, 1, Lk))

    fwd = jax.jit(functools.partial(scaled_dot_product_attention, d_k=Dk))
    context, attn = fwd(Q, K, V, attn_mask)
    context = jax.block_until_ready(context)
    attn = jax.block_until_ready(attn)

    # Pure-JAX f32 reference (tolerance covers the bf16 MXU operands).
    ref_scores = (jnp.einsum("bhqd,bhkd->bhqk", Q, K) / math.sqrt(Dk)
                  + attn_mask)
    ref_attn = jax.nn.softmax(ref_scores, axis=-1)
    ref_ctx = jnp.einsum("bhqk,bhkd->bhqd", ref_attn, V)

    assert context.shape == (B, H, Lq, Dk)
    assert attn.shape == (B, H, Lq, Lk)
    assert bool(jnp.all(jnp.isfinite(context)))
    assert bool(jnp.all(jnp.isfinite(attn)))
    # softmax rows sum to 1 (exact reciprocal) and masked keys ~0
    assert bool(jnp.allclose(jnp.sum(attn, axis=-1), 1.0, atol=1e-4))
    assert bool(jnp.all(attn[..., Lk - 2:] < 1e-4))
    # match the f32 reference within bf16-MXU tolerance
    assert bool(jnp.allclose(attn, ref_attn, atol=5e-2))
    assert bool(jnp.allclose(context, ref_ctx, atol=5e-2))
    print("KERNEL_OK")
</pallas_src>

<mosaic_0001>
module attributes {stable_mosaic.version = 11 : i64} {
  func.func @sdpa_kernel(%arg0: i32, %arg1: i32, %arg2: memref<6x8x32xf32, #tpu.memory_space<vmem>>, %arg3: memref<6x8x32xf32, #tpu.memory_space<vmem>>, %arg4: memref<6x8x32xf32, #tpu.memory_space<vmem>>, %arg5: memref<6x1x8xf32, #tpu.memory_space<vmem>>, %arg6: memref<6x8x32xf32, #tpu.memory_space<vmem>>, %arg7: memref<6x8x8xf32, #tpu.memory_space<vmem>>) attributes {dimension_semantics = [#tpu.dimension_semantics<parallel>, #tpu.dimension_semantics<parallel>], iteration_bounds = array<i64: 2, 1>, scalar_prefetch = 0 : i64, scratch_operands = 0 : i64, tpu.core_type = #tpu.core_type<tc>, window_params = [{transform_indices = @transform_0, window_bounds = array<i64: 6, 8, 32>}, {transform_indices = @transform_1, window_bounds = array<i64: 6, 8, 32>}, {transform_indices = @transform_2, window_bounds = array<i64: 6, 8, 32>}, {transform_indices = @transform_3, window_bounds = array<i64: 6, 1, 8>}, {transform_indices = @transform_4, window_bounds = array<i64: 6, 8, 32>}, {transform_indices = @transform_5, window_bounds = array<i64: 6, 8, 8>}]} {
    %c0 = arith.constant 0 : index
    %c0_0 = arith.constant 0 : index
    %c0_1 = arith.constant 0 : index
    %0 = vector.load %arg2[%c0, %c0_0, %c0_1] : memref<6x8x32xf32, #tpu.memory_space<vmem>>, vector<6x8x32xf32>
    %cst = arith.constant 0.176776692 : f32
    %1 = vector.broadcast %cst : f32 to vector<6x8x32xf32>
    %2 = arith.mulf %0, %1 : vector<6x8x32xf32>
    %3 = arith.truncf %2 : vector<6x8x32xf32> to vector<6x8x32xbf16>
    %c0_2 = arith.constant 0 : index
    %c0_3 = arith.constant 0 : index
    %c0_4 = arith.constant 0 : index
    %4 = vector.load %arg3[%c0_2, %c0_3, %c0_4] : memref<6x8x32xf32, #tpu.memory_space<vmem>>, vector<6x8x32xf32>
    %5 = arith.truncf %4 : vector<6x8x32xf32> to vector<6x8x32xbf16>
    "tpu.trace_start"() <{level = 10 : i32, message = "nqd,nkd->nqk"}> : () -> ()
    %cst_5 = arith.constant dense<0.000000e+00> : vector<6x8x8xf32>
    %6 = tpu.matmul %3, %5, %cst_5 {dimension_numbers = #tpu.dot_dimension_numbers<[2], [2], [1], [1], [0, 0, 0, 1, 1, 1], [0], [0]>} : vector<6x8x32xbf16>, vector<6x8x32xbf16>, vector<6x8x8xf32> -> vector<6x8x8xf32>
    "tpu.trace_stop"() : () -> ()
    %c0_6 = arith.constant 0 : index
    %c0_7 = arith.constant 0 : index
    %c0_8 = arith.constant 0 : index
    %7 = vector.load %arg5[%c0_6, %c0_7, %c0_8] : memref<6x1x8xf32, #tpu.memory_space<vmem>>, vector<6x1x8xf32>
    %8 = vector.broadcast %7 : vector<6x1x8xf32> to vector<6x8x8xf32>
    %9 = arith.addf %6, %8 : vector<6x8x8xf32>
    %cst_9 = arith.constant dense<0xFF800000> : vector<6x8xf32>
    %10 = vector.multi_reduction <maximumf>, %9, %cst_9 [2] : vector<6x8x8xf32> to vector<6x8xf32>
    %11 = vector.shape_cast %10 : vector<6x8xf32> to vector<6x8x1xf32>
    %12 = vector.broadcast %11 : vector<6x8x1xf32> to vector<6x8x8xf32>
    %13 = arith.subf %9, %12 : vector<6x8x8xf32>
    %14 = math.exp %13 : vector<6x8x8xf32>
    %cst_10 = arith.constant dense<0.000000e+00> : vector<6x8xf32>
    %15 = vector.multi_reduction <add>, %14, %cst_10 [2] : vector<6x8x8xf32> to vector<6x8xf32>
    %16 = vector.shape_cast %15 : vector<6x8xf32> to vector<6x8x1xf32>
    %cst_11 = arith.constant 1.000000e+00 : f32
    %17 = vector.broadcast %cst_11 : f32 to vector<6x8x1xf32>
    %18 = arith.divf %17, %16 : vector<6x8x1xf32>
    %19 = vector.broadcast %18 : vector<6x8x1xf32> to vector<6x8x8xf32>
    %20 = arith.mulf %14, %19 : vector<6x8x8xf32>
    %c0_12 = arith.constant 0 : index
    %c0_13 = arith.constant 0 : index
    %c0_14 = arith.constant 0 : index
    %21 = vector.load %arg4[%c0_12, %c0_13, %c0_14] : memref<6x8x32xf32, #tpu.memory_space<vmem>>, vector<6x8x32xf32>
    %22 = arith.truncf %21 : vector<6x8x32xf32> to vector<6x8x32xbf16>
    %23 = arith.truncf %20 : vector<6x8x8xf32> to vector<6x8x8xbf16>
    "tpu.trace_start"() <{level = 10 : i32, message = "nqk,nkd->nqd"}> : () -> ()
    %cst_15 = arith.constant dense<0.000000e+00> : vector<6x8x32xf32>
    %24 = tpu.matmul %23, %22, %cst_15 {dimension_numbers = #tpu.dot_dimension_numbers<[2], [1], [1], [2], [0, 0, 0, 1, 1, 2], [0], [0]>} : vector<6x8x8xbf16>, vector<6x8x32xbf16>, vector<6x8x32xf32> -> vector<6x8x32xf32>
    "tpu.trace_stop"() : () -> ()
    %c0_16 = arith.constant 0 : index
    %c0_17 = arith.constant 0 : index
    %c0_18 = arith.constant 0 : index
    %25 = vector.load %arg6[%c0_16, %c0_17, %c0_18] : memref<6x8x32xf32, #tpu.memory_space<vmem>>, vector<6x8x32xf32>
    tpu.vector_store %arg6[%c0_16, %c0_17, %c0_18], %24 {strides = array<i32>} : memref<6x8x32xf32, #tpu.memory_space<vmem>>, vector<6x8x32xf32>,
    %c0_19 = arith.constant 0 : index
    %c0_20 = arith.constant 0 : index
    %c0_21 = arith.constant 0 : index
    %26 = vector.load %arg7[%c0_19, %c0_20, %c0_21] : memref<6x8x8xf32, #tpu.memory_space<vmem>>, vector<6x8x8xf32>
    tpu.vector_store %arg7[%c0_19, %c0_20, %c0_21], %20 {strides = array<i32>} : memref<6x8x8xf32, #tpu.memory_space<vmem>>, vector<6x8x8xf32>,
    return
  }
  func.func @transform_0(%arg0: i32, %arg1: i32) -> (i32, i32, i32) {
    %c0_i32 = arith.constant 0 : i32
    %c0_i32_0 = arith.constant 0 : i32
    return %arg0, %arg1, %c0_i32 : i32, i32, i32
  }
  func.func @transform_1(%arg0: i32, %arg1: i32) -> (i32, i32, i32) {
    %c0_i32 = arith.constant 0 : i32
    %c0_i32_0 = arith.constant 0 : i32
    %c0_i32_1 = arith.constant 0 : i32
    return %arg0, %c0_i32, %c0_i32_0 : i32, i32, i32
  }
  func.func @transform_2(%arg0: i32, %arg1: i32) -> (i32, i32, i32) {
    %c0_i32 = arith.constant 0 : i32
    %c0_i32_0 = arith.constant 0 : i32
    %c0_i32_1 = arith.constant 0 : i32
    return %arg0, %c0_i32, %c0_i32_0 : i32, i32, i32
  }
  func.func @transform_3(%arg0: i32, %arg1: i32) -> (i32, i32, i32) {
    %c0_i32 = arith.constant 0 : i32
    %c0_i32_0 = arith.constant 0 : i32
    %c0_i32_1 = arith.constant 0 : i32
    return %arg0, %c0_i32, %c0_i32_0 : i32, i32, i32
  }
  func.func @transform_4(%arg0: i32, %arg1: i32) -> (i32, i32, i32) {
    %c0_i32 = arith.constant 0 : i32
    %c0_i32_0 = arith.constant 0 : i32
    return %arg0, %arg1, %c0_i32 : i32, i32, i32
  }
  func.func @transform_5(%arg0: i32, %arg1: i32) -> (i32, i32, i32) {
    %c0_i32 = arith.constant 0 : i32
    %c0_i32_0 = arith.constant 0 : i32
    return %arg0, %arg1, %c0_i32 : i32, i32, i32
  }
}

</mosaic_0001>

<bundles_post_ra>
// kernel: scaled_dot_product_attention.1
= control target key start
LH: loop header
LB: loop body
LE: loop exit
PB: predicated region body
PF: predicated region fallthrough
CT: control target
= control target key end

     0   :  { %s1756_s0 = inlined_call_operand.hbm [shape: f32[12,8,32], index: 0, kind: input, shape index: {}]   ;;  %s1757_s1 = inlined_call_operand.hbm [shape: f32[12,8,32], index: 1, kind: input, shape index: {}]   ;;  %s1758_s2 = inlined_call_operand.hbm [shape: f32[12,8,32], index: 2, kind: input, shape index: {}]   ;;  %s1759_s3 = inlined_call_operand.vmem [shape: f32[12,1,8], index: 3, kind: input, shape index: {}]   ;;  %s1760_s4 = inlined_call_operand.hbm [shape: f32[12,8,32], index: 4, kind: output, shape index: {0}]   ;;  %s1761_s5 = inlined_call_operand.hbm [shape: f32[12,8,8], index: 5, kind: output, shape index: {1}]  }
   0x1   :  { %1769 = sst [smem:[#allocation22_spill]] %s1757_s1 }
   0x2   :  { %11 = vsyncpa [#allocation3], 0 }
   0x3   :  { %13 = vsyncpa [#allocation3 + $0x1], 0 }
   0x4   :  { %14 = vsyncpa [#allocation6], 0 }
   0x5   :  { %16 = vsyncpa [#allocation6 + $0x1], 0 }
   0x6   :  { %17 = vsyncpa [#allocation4], 0 }
   0x7   :  { %19 = vsyncpa [#allocation4 + $0x1], 0 }
   0x8   :  { %20 = vsyncpa [#allocation10], 0 }
   0x9   :  { %22 = vsyncpa [#allocation10 + $0x1], 0  ;;  %s1446_s18 = smov 0   ;;  %s1448_s19 = smov 0  }
   0xa   :  { %s1450_s20 = smov 0   ;;  %s1452_s21 = smov 0  }
   0xb   :  { %s1454_s22 = smov 0   ;;  %s1456_s23 = smov 0  }
   0xc LB: > { %1770 = sst [smem:[#allocation15_spill]] %s1390_s18  ;;  %s1477_s24 = sadd.s32 4294967295, %s1410_s23   ;;  %s1410_s23 = sphi %s1456_s23, %s28_s23   ;;  %s1406_s22 = sphi %s1454_s22, %s1792_s22   ;;  %s1402_s21 = sphi %s1452_s21, %s1791_s21   ;;  %s1398_s20 = sphi %s1450_s20, %s1790_s20   ;;  %s1394_s19 = sphi %s1448_s19, %s1794_s19   ;;  %s1390_s18 = sphi %s1446_s18, %s1793_s18  }
   0xd   : > { %1771 = sst [smem:[#allocation16_spill]] %s1398_s20  ;;  %s1059_s25 = sadd.s32 4294967294, %s1410_s23  }
   0xe   : > { %1772 = sst [smem:[#allocation17_spill]] %s1406_s22  ;;  %s40_s26 = sadd.s32 1, %s1406_s22 }
   0xf   : > { %1773 = sst [smem:[#allocation18_spill]] %s1410_s23  ;;  %s49_s27 = sadd.s32 1, %s1398_s20 }
  0x10   : > { %p42_p0 = scmp.ge.s32.totalorder %s40_s26, 2  ;;  %p56_p1 = scmp.ne.s32.totalorder %s1398_s20, %s1394_s19 }
  0x11   : > { %p57_p2 = scmp.eq.s32.totalorder %s1410_s23, 0  ;;  %p62_p3 = scmp.ne.s32.totalorder %s1394_s19, %s1390_s18 }
  0x12   : > { %s1796_s26 = smov (%p42_p0, %s40_s26), 0  ;;  %p63_p5 = scmp.eq.s32.totalorder %s1477_s24, 0 }
  0x13   : > { %1774 = sst [smem:[#allocation19_spill]] %s1796_s26  ;;  %p1489_p4 = por %p57_p2, %p56_p1 }
  0x14   : > { %s44_s29 = ssub.s32 %s1406_s22, %s1796_s26  ;;  %p166_p6 = scmp.eq.s32.totalorder %s1477_s24, 1 }
  0x15   : > { %p47_p7 = scmp.eq.s32.totalorder %s44_s29, 0  ;;  %p1497_p8 = por %p63_p5, %p62_p3 }
  0x16   : > { %p1501_p9 = por %p166_p6, %p56_p1  ;;  %p172_p10 = scmp.eq.s32.totalorder %s1059_s25, 1 }
  0x17   : > { %s1506_s7 = scalar_select %p47_p7, %s1398_s20, %s49_s27  }
  0x18   : > { %p1508_p11 = por %p172_p10, %p62_p3  ;;  %p1061_p12 = scmp.ge.s32.totalorder %s1410_s23, 2 }
  0x19   : > { %1778 = sst [smem:[#allocation20_spill]] %s1506_s7  ;;  %p1118_p13 = scmp.lt.s32.totalorder %s1410_s23, 2 }
  0x1a   : > { %s1779_s8 = scalar_select %p1508_p11, 1, 0 }
  0x1b   : > { %s220_s9 = sand.u32 1, %s1398_s20   ;;  %s1082_s11 = smul.u32 48, %s1406_s22 }
  0x1c   : > { %1780 = sst [smem:[#allocation21_spill]] %s1779_s8  ;;  %s1515_s10 = smul.u32 48, %s220_s9 }
  0x1d   : > { %p1520_p0 = pnand %p1118_p13, %p1489_p4  ;;  %s243_s13 = sand.u32 1, %s1410_s23  }
  0x1e   : > { %s1782_s1 = sld [smem:[#allocation22_spill]]  ;;  %s247_s25 = scalar_lea.vmem [#allocation5], %s1515_s10 }
  0x1f   : > { %s255_s27 = sshll.u32 %s247_s25, 4  ;;  %s244_s29 = scalar_lea.sflag [#allocation6], %s243_s13  ;;  %s256_s27 = int_to_ptr.vmem [resolvable:$true] %s255_s27 }
  0x20   : > { %s1412_s26 = smov 128   ;;  %s1413_s28 = smov 8  }
  0x21   : > { %p1065_p1 = scmp.ge.s32.totalorder %s1410_s23, 1  ;;  %p293_p2 = scmp.lt.s32.totalorder %s1410_s23, 3 }
  0x22   : > { %s221_s13 = scalar_lea.sflag [#allocation3], %s220_s9  ;;  %s274_s20 = scalar_lea.hbm %s1758_s2, %s1082_s11 }
  0x23   : > { %p1533_p3 = pnand %p1065_p1, %p293_p2  ;;  %s275_s23 = sshll.u32 %s274_s20, 4  ;;  %s276_s23 = int_to_ptr.hbm [resolvable:$true] %s275_s23 }
  0x24   : > { %s252_s16 = scalar_lea.hbm %s1782_s1, %s1082_s11  ;;  %s224_s1 = scalar_lea.vmem [#allocation2], %s1515_s10 }
  0x25   : > { %s253_s17 = sshll.u32 %s252_s16, 4  ;;  %s230_s16 = scalar_lea.hbm %s1756_s0, %s1082_s11  ;;  %s254_s17 = int_to_ptr.hbm [resolvable:$true] %s253_s17 }
  0x26   : > { %1107 = dma.hbm_to_vmem [thread:$0]  (!%p1520_p0), %s254_s17, 768, %s256_s27, %s244_s29, %s1412_s26, %s1412_s26, %s1413_s28  }
  0x27   : > { %s231_s25 = sshll.u32 %s230_s16, 4  ;;  %s233_s7 = sshll.u32 %s224_s1, 4  ;;  %s232_s25 = int_to_ptr.hbm [resolvable:$true] %s231_s25  ;;  %s234_s7 = int_to_ptr.vmem [resolvable:$true] %s233_s7 }
  0x28   : > { %1104 = dma.hbm_to_vmem [thread:$0]  (!%p1520_p0), %s232_s25, 768, %s234_s7, %s221_s13, %s1412_s26, %s1412_s26, %s1413_s28  }
  0x29   : > { %s269_s8 = scalar_lea.vmem [#allocation7], %s1515_s10  ;;  %297 = sbr.rel (%p1533_p3) target bundleno = 621 (0x26d), region = 36 }
  0x2a   : > { %s277_s18 = sshll.u32 %s269_s8, 4  ;;  %s1552_s1 = sand.u32 (!%p1533_p3), 1, %s1394_s19   ;;  %s278_s18 = int_to_ptr.vmem [resolvable:$true] %s277_s18 }
  0x2b   : > { %1110 = dma.hbm_to_vmem [thread:$0]  (!%p1520_p0), %s276_s23, 768, %s278_s18, %s244_s29, %s1412_s26, %s1412_s26, %s1413_s28  }
  0x2c   : > { %s1555_s7 = smul.u32 (!%p1533_p3), 48, %s1552_s1  ;;  %s300_s9 = scalar_lea.sflag (!%p1533_p3), [#allocation3], %s1552_s1 }
  0x2e   : > { %s1559_s20 = scalar_lea.vmem [#allocation2], %s1555_s7 }
  0x2f   : > { %1373 = dma.done.wait (%p1497_p8), %s300_s9, 768  }
  0x30   : > { %1375 = vsyncadd (%p1497_p8), %s300_s9, 4294966528  ;;  %s309_s18 = sand.u32 1, %s1477_s24   ;;  %s313_s23 = scalar_lea.vmem [#allocation5], %s1555_s7 }
  0x31   : > { %s310_s22 = scalar_lea.sflag [#allocation6], %s309_s18 }
  0x32   : > { %1377 = dma.done.wait (%p1497_p8), %s310_s22, 1536  }
  0x33   : > { %1379 = vsyncadd (%p1497_p8), %s310_s22, 4294965760  ;;  %s373_s26 = smul.u32 6, %s1402_s21  ;;  %v399_v0 = vld [vmem:[%s313_s23] sm:$0xff]  ;;  %vm435_vm0 = vcmask 261120   ;;  %v400_v1 = vld [vmem:[%s313_s23 + $0x8] sm:$0xff]  ;;  %vm550_vm1 = vcmask 64512  }
  0x34   : > { %v401_v2 = vld [vmem:[%s313_s23 + $0x10] sm:$0xff]  ;;  %v405_v3 = vpack.c.bf16 %v399_v0, %v399_v0  ;;  %v406_v4 = vpack.c.bf16 %v400_v1, %v400_v1  ;;  %v381_v6 = vld [vmem:[%s1559_s20] sm:$0xff]  ;;  %v382_v7 = vld [vmem:[%s1559_s20 + $0x8] sm:$0xff]  ;;  %s323_s10 = scalar_lea.vmem [#allocation7], %s1555_s7  ;;  %vm722_vm2 = vcmask 1043456   ;;  %s1640_s11 = scalar_lea.vmem [#allocation9], %s1555_s7 }
  0x35   : > { %p374_p4 = scmp.lt.s32.totalorder %s373_s26, 11  ;;  %v407_v5 = vpack.c.bf16 %v401_v2, %v401_v2  ;;  %v383_v8 = vld [vmem:[%s1559_s20 + $0x10] sm:$0xff]  ;;  %v387_v9 = vmul.f32 0.17677669, %v381_v6  ;;  %v388_v10 = vmul.f32 0.17677669, %v382_v7 }
  0x36   : > { %v440_v11 = vsel %vm435_vm0, %v405_v3, 0  ;;  %v459_v12 = vsel %vm435_vm0, %v406_v4, 0  ;;  %v403_v14 = vld [vmem:[%s313_s23 + $0x20] sm:$0xff]  ;;  %v402_v15 = vld [vmem:[%s313_s23 + $0x18] sm:$0xff]  ;;  %v389_v17 = vmul.f32 0.17677669, %v383_v8 }
  0x37   : > { %s1798_s26 = smov (!%p374_p4, %s373_s26), 11  ;;  %v478_v13 = vsel %vm435_vm0, %v407_v5, 0  ;;  %v384_v16 = vld [vmem:[%s1559_s20 + $0x18] sm:$0xff]  ;;  %449 = vmatpush.bf16.xpose.msra.mxu0 %v440_v11  ;;  %468 = vmatpush.bf16.xpose.msra.mxu1 %v459_v12  ;;  %v404_v18 = vld [vmem:[%s313_s23 + $0x28] sm:$0xff]  ;;  %v409_v19 = vpack.c.bf16 %v403_v14, %v403_v14  ;;  %v408_v20 = vpack.c.bf16 %v402_v15, %v402_v15  ;;  %v393_v22 = vpack.c.bf16 %v387_v9, %v387_v9  ;;  %v385_v30 = vld [vmem:[%s1559_s20 + $0x20] sm:$0xff]  ;;  %s1085_s12 = smul.u32 48, %s1402_s21 }
  0x38   : > { %s1582_s8 = scalar_lea.vmem %s1759_s3, %s1798_s26  ;;  %487 = vmatpush.bf16.xpose.msra.mxu2 %v478_v13  ;;  %v410_v21 = vpack.c.bf16 %v404_v18, %v404_v18  ;;  %v390_v23 = vmul.f32 0.17677669, %v384_v16  ;;  %v394_v24 = vpack.c.bf16 %v388_v10, %v388_v10  ;;  %v395_v28 = vpack.c.bf16 %v389_v17, %v389_v17  ;;  %v386_v31 = vld [vmem:[%s1559_s20 + $0x28] sm:$0xff]  ;;  %s883_s29 = sshll.u32 %s1640_s11, 4  ;;  %s884_s29 = int_to_ptr.vmem [resolvable:$true] %s883_s29 }
  0x39   : > { %v516_v25 = vsel %vm435_vm0, %v409_v19, 0  ;;  %v497_v26 = vsel %vm435_vm0, %v408_v20, 0  ;;  %v391_v32 = vmul.f32 0.17677669, %v385_v30  ;;  %v392_v33 = vmul.f32 0.17677669, %v386_v31  ;;  %s882_s15 = scalar_lea.hbm %s1761_s5, %s1085_s12 }
  0x3a   : > { %v535_v27 = vsel %vm435_vm0, %v410_v21, 0  ;;  %506 = vmatpush.bf16.xpose.msra.mxu3 %v497_v26  ;;  %v396_v29 = vpack.c.bf16 %v390_v23, %v390_v23  ;;  %v1172_v36 = vld [vmem:[%s1582_s8] ss:$0 sm:$0xff]  ;;  %v1173_v40 = vld [vmem:[%s1582_s8 + $0x1] ss:$0 sm:$0xff]  ;;  %s885_s16 = sshll.u32 %s882_s15, 4  ;;  %s886_s16 = int_to_ptr.hbm [resolvable:$true] %s885_s16 }
  0x3b   : > { %v397_v34 = vpack.c.bf16 %v391_v32, %v391_v32  ;;  %v398_v35 = vpack.c.bf16 %v392_v33, %v392_v33  ;;  %v1174_v42 = vld [vmem:[%s1582_s8 + $0x2] ss:$0 sm:$0xff]  ;;  %v1175_v48 = vld [vmem:[%s1582_s8 + $0x3] ss:$0 sm:$0xff]  ;;  %v1176_v53 = vld [vmem:[%s1582_s8 + $0x4] ss:$0 sm:$0xff] }
  0x3c   : > { %v1177_v59 = vld [vmem:[%s1582_s8 + $0x5] ss:$0 sm:$0xff]  ;;  %s852_s25 = scalar_lea.sflag [#allocation10], %s1552_s1  ;;  %s1306_s13 = sshra.s32 %s886_s16, 4  ;;  %s1307_s13 = int_to_ptr.hbm [resolvable:$true] %s1306_s13 }
  0x3d   : > { %v701_v32 = vld [vmem:[%s323_s10] sm:$0xff]  ;;  %s1308_s17 = scalar_lea.hbm %s1307_s13, 48  ;;  %s1312_s20 = scalar_lea.hbm %s1761_s5, 96 }
  0x3e   : > { %1066 = vmatmul.msk.bf16.vlgmr.msra.gmra.mxu0 %vm435_vm0, %v393_v22  ;;  %1067 = vmatmul.msk.bf16.vlgmr.msra.gmra.mxu1 %vm435_vm0, %v394_v24  ;;  %v707_v33 = vpack.c.bf16 %v701_v32, %v701_v32  ;;  %p1309_p5 = scmp.ne.s32.totalorder %s1307_s13, %s1308_s17  ;;  %p1313_p8 = scmp.lt.s32.totalorder %s1307_s13, %s1761_s5 }
  0x3f   : > { %525 = vmatpush.bf16.xpose.msrb.mxu0 %v516_v25  ;;  %544 = vmatpush.bf16.xpose.msrb.mxu1 %v535_v27  ;;  %p1314_p10 = scmp.lt.s32.totalorder %s1312_s20, %s1308_s17 }
  0x40   : > { %1068 = vmatmul.msk.bf16.vlgmr.msra.gmra.mxu2 %vm435_vm0, %v395_v28  ;;  %p1310_p6 = pnand %p1309_p5, %p1501_p9 }
  0x41   : > { %1069 = vmatmul.msk.bf16.vlgmr.msra.gmra.mxu3 %vm435_vm0, %v396_v29  ;;  %p1315_p13 = por %p1314_p10, %p1313_p8 }
  0x42   : > { %p1311_p7 = pneg %p1310_p6 }
  0x44   : > { %p1316_p0 = pnand %p1315_p13, %p1311_p7 }
  0x4e   : > { %1070 = vmatmul.msk.bf16.vlgmr.msrb.gmra.mxu0 %vm435_vm0, %v397_v34  ;;  %1071 = vmatmul.msk.bf16.vlgmr.msrb.gmra.mxu1 %vm435_vm0, %v398_v35  ;;  %v724_v34 = vsel %vm722_vm2, %v707_v33, 0  ;;  %v702_v35 = vld [vmem:[%s323_s10 + $0x8] sm:$0xff] }
  0x4f   : > { %733 = vmatpush.bf16.msrb.mxu2 %v724_v34 }
  0xbb   : > { %v451_v37 = vpop.f32.mrf.mxu0  ;;  %v470_v38 = vpop.f32.mrf.mxu1 }
  0xbc   : > { %v452_v39 = vadd.f32 %v1172_v36, %v451_v37  ;;  %v471_v43 = vadd.f32 %v1173_v40, %v470_v38  ;;  %v708_v36 = vpack.c.bf16 %v702_v35, %v702_v35  ;;  %v703_v40 = vld [vmem:[%s323_s10 + $0x10] sm:$0xff] }
  0xbe   : > { %v551_v41 = vsel %vm550_vm1, %v452_v39, -inf  ;;  %v554_v49 = vsel %vm550_vm1, %v471_v43, -inf  ;;  %v743_v37 = vsel %vm722_vm2, %v708_v36, 0 }
  0xbf   : > { %552 = vmax.xlane.f32.xlu0 %v551_v41  ;;  %752 = vmatpush.bf16.msrb.mxu3 %v743_v37 }
  0xc3   : > { %v489_v44 = vpop.f32.mrf.mxu2  ;;  %v453_v46 = vpop.f32.mrf.mxu0 }
  0xc4   : > { %v490_v45 = vadd.f32 %v1174_v42, %v489_v44  ;;  %v472_v47 = vpop.f32.mrf.mxu1  ;;  %v508_v51 = vpop.f32.mrf.mxu3  ;;  %v709_v42 = vpack.c.bf16 %v703_v40, %v703_v40 }
  0xc5   : > { %v509_v52 = vadd.f32 %v1175_v48, %v508_v51 }
  0xc6   : > { %v557_v50 = vsel %vm550_vm1, %v490_v45, -inf  ;;  %v762_v44 = vsel %vm722_vm2, %v709_v42, 0 }
  0xc7   : > { %558 = vmax.xlane.f32.xlu2 %v557_v50  ;;  %555 = vmax.xlane.f32.xlu0 %v554_v49  ;;  %v560_v57 = vsel %vm550_vm1, %v509_v52, -inf  ;;  %v706_v49 = vld [vmem:[%s323_s10 + $0x28] sm:$0xff]  ;;  %v704_v50 = vld [vmem:[%s323_s10 + $0x18] sm:$0xff] }
  0xc8   : > { %771 = vmatpush.bf16.msra.mxu0 %v762_v44  ;;  %v712_v51 = vpack.c.bf16 %v706_v49, %v706_v49 }
  0xcb   : > { %v491_v54 = vpop.f32.mrf.mxu2  ;;  %v527_v55 = vpop.f32.mrf.mxu0 }
  0xcc   : > { %v546_v56 = vpop.f32.mrf.mxu1  ;;  %v528_v58 = vadd.f32 %v1176_v53, %v527_v55  ;;  %v510_v60 = vpop.f32.mrf.mxu3  ;;  %v819_v55 = vsel %vm722_vm2, %v712_v51, 0 }
  0xcd   : > { %v547_v62 = vadd.f32 %v1177_v59, %v546_v56  ;;  %828 = vmatpush.bf16.msra.mxu3 %v819_v55 }
  0xce   : > { %v563_v61 = vsel %vm550_vm1, %v528_v58, -inf }
  0xcf   : > { %561 = vmax.xlane.f32.xlu2 %v560_v57  ;;  %564 = vmax.xlane.f32.xlu1 %v563_v61  ;;  %v566_v1 = vsel %vm550_vm1, %v547_v62, -inf }
  0xd3   : > { %v529_v63 = vpop.f32.mrf.mxu0 }
  0xd4   : > { %v548_v0 = vpop.f32.mrf.mxu1 }
  0xd7   : > { %567 = vmax.xlane.f32.xlu1 %v566_v1 }
 0x132   : > { %v553_v2 = vpop.xlane.xlu0 %552 }
 0x133   : > { %v569_v3 = vsub.f32 %v452_v39, %v553_v2  ;;  %v705_v39 = vld [vmem:[%s323_s10 + $0x20] sm:$0xff] }
 0x134   : > { %v711_v41 = vpack.c.bf16 %v705_v39, %v705_v39 }
 0x135   : > { %v575_v4 = vmul.f32 1.442695, %v569_v3 }
 0x137   : > { %1178 = vpow2.f32 %v575_v4 }
 0x13a   : > { %v559_v5 = vpop.xlane.xlu2 %558  ;;  %v556_v6 = vpop.xlane.xlu0 %555 }
 0x13b   : > { %v570_v7 = vsub.f32 %v471_v43, %v556_v6  ;;  %v571_v9 = vsub.f32 %v490_v45, %v559_v5  ;;  %v800_v43 = vsel %vm722_vm2, %v711_v41, 0 }
 0x13c   : > { %809 = vmatpush.bf16.msra.mxu2 %v800_v43 }
 0x13d   : > { %v1607_v8 = vpop.eup %1178  ;;  %v577_v10 = vmul.f32 1.442695, %v570_v7  ;;  %v579_v12 = vmul.f32 1.442695, %v571_v9 }
 0x13e   : > { %v587_v11 = vsel %vm550_vm1, %v1607_v8, 0.0 }
 0x13f   : > { %1180 = vpow2.f32 %v577_v10  ;;  %588 = vadd.xlane.f32.xlu0 %v587_v11 }
 0x140   : > { %1182 = vpow2.f32 %v579_v12 }
 0x142   : > { %v562_v13 = vpop.xlane.xlu2 %561  ;;  %v565_v14 = vpop.xlane.xlu1 %564 }
 0x143   : > { %v573_v15 = vsub.f32 %v528_v58, %v565_v14  ;;  %v572_v17 = vsub.f32 %v509_v52, %v562_v13  ;;  %v710_v52 = vpack.c.bf16 %v704_v50, %v704_v50 }
 0x145   : > { %v1611_v16 = vpop.eup %1180  ;;  %v583_v18 = vmul.f32 1.442695, %v573_v15  ;;  %v581_v20 = vmul.f32 1.442695, %v572_v17  ;;  %v781_v56 = vsel %vm722_vm2, %v710_v52, 0 }
 0x146   : > { %v590_v19 = vsel %vm550_vm1, %v1611_v16, 0.0  ;;  %v1615_v22 = vpop.eup %1182  ;;  %790 = vmatpush.bf16.msra.mxu1 %v781_v56 }
 0x147   : > { %1184 = vpow2.f32 %v583_v18  ;;  %591 = vadd.xlane.f32.xlu1 %v590_v19  ;;  %v593_v27 = vsel %vm550_vm1, %v1615_v22, 0.0 }
 0x148   : > { %1186 = vpow2.f32 %v581_v20 }
 0x14a   : > { %v568_v21 = vpop.xlane.xlu1 %567 }
 0x14b   : > { %v574_v23 = vsub.f32 %v547_v62, %v568_v21 }
 0x14d   : > { %v1617_v24 = vpop.eup %1184  ;;  %v585_v25 = vmul.f32 1.442695, %v574_v23 }
 0x14e   : > { %v599_v26 = vsel %vm550_vm1, %v1617_v24, 0.0  ;;  %v1623_v28 = vpop.eup %1186 }
 0x14f   : > { %1188 = vpow2.f32 %v585_v25  ;;  %600 = vadd.xlane.f32.xlu2 %v599_v26  ;;  %594 = vadd.xlane.f32.xlu1 %v593_v27  ;;  %v596_v30 = vsel %vm550_vm1, %v1623_v28, 0.0 }
 0x155   : > { %v1625_v29 = vpop.eup %1188 }
 0x156   : > { %v602_v31 = vsel %vm550_vm1, %v1625_v29, 0.0 }
 0x157   : > { %597 = vadd.xlane.f32.xlu2 %v596_v30  ;;  %603 = vadd.xlane.f32.xlu0 %v602_v31 }
 0x1b2   : > { %v589_v38 = vpop.xlane.xlu0 %588 }
 0x1b3   : > { %1190 = vrcp.f32 %v589_v38  ;;  %v616_v54 = vand.u32 2147483648, %v589_v38  ;;  %vm610_vm4 = vweird.f32 %v589_v38  ;;  %v614_v58 = vand.u32 2147483647, %v589_v38 }
 0x1b5   : > { %v617_v0 = vor.u32 1.1754944e-38, %v616_v54  ;;  %vm615_vm6 = vcmp.eq.f32.partialorder %v614_v58, 8.507059e+37 }
 0x1b9   : > { %v1191_v45 = vpop.eup %1190 }
 0x1ba   : > { %v606_v46 = vmul.f32 %v1191_v45, %v589_v38  ;;  %v592_v47 = vpop.xlane.xlu1 %591  ;;  %vm611_vm3 = vweird.f32 %v1191_v45 }
 0x1bb   : > { %1192 = vrcp.f32 %v592_v47  ;;  %vm612_vm5 = vmor %vm610_vm4, %vm611_vm3  ;;  %v631_v6 = vand.u32 2147483648, %v592_v47  ;;  %vm625_vm8 = vweird.f32 %v592_v47  ;;  %v629_v10 = vand.u32 2147483647, %v592_v47 }
 0x1bc   : > { %v607_v48 = vsub.f32 1.0, %v606_v46 }
 0x1bd   : > { %v632_v18 = vor.u32 1.1754944e-38, %v631_v6  ;;  %vm630_vm10 = vcmp.eq.f32.partialorder %v629_v10, 8.507059e+37 }
 0x1be   : > { %v608_v53 = vmul.f32 %v1191_v45, %v607_v48 }
 0x1c0   : > { %v609_v57 = vadd.f32 %v1191_v45, %v608_v53 }
 0x1c1   : > { %v1193_v59 = vpop.eup %1192 }
 0x1c2   : > { %v613_v60 = vsel %vm612_vm5, %v1191_v45, %v609_v57  ;;  %v621_v61 = vmul.f32 %v1193_v59, %v592_v47  ;;  %v601_v62 = vpop.xlane.xlu2 %600  ;;  %v595_v63 = vpop.xlane.xlu1 %594  ;;  %vm626_vm7 = vweird.f32 %v1193_v59 }
 0x1c3   : > { %1194 = vrcp.f32 %v601_v62  ;;  %v618_v2 = vsel %vm615_vm6, %v617_v0, %v613_v60  ;;  %vm1644_vm9 = vmor %vm625_vm8, %vm626_vm7  ;;  %v674_v20 = vand.u32 2147483647, %v601_v62  ;;  %v676_v21 = vand.u32 2147483648, %v601_v62 }
 0x1c4   : > { %v622_v1 = vsub.f32 1.0, %v621_v61  ;;  %1196 = vrcp.f32 %v595_v63  ;;  %v695_v4 = vmul.f32 %v1607_v8, %v618_v2  ;;  %v646_v26 = vand.u32 2147483648, %v595_v63 }
 0x1c5   : > { %v644_v31 = vand.u32 2147483647, %v595_v63  ;;  %vm670_vm13 = vweird.f32 %v601_v62  ;;  %v677_v35 = vor.u32 1.1754944e-38, %v676_v21  ;;  %vm640_vm15 = vweird.f32 %v595_v63 }
 0x1c6   : > { %v623_v3 = vmul.f32 %v1193_v59, %v622_v1  ;;  %v713_v7 = vpack.c.bf16 %v695_v4, %v695_v4  ;;  %840 = vst.msk [vmem:[%s1640_s11] sm:$0xff] %vm550_vm1, %v695_v4  ;;  %vm675_vm2 = vcmp.eq.f32.partialorder %v674_v20, 8.507059e+37  ;;  %v647_v40 = vor.u32 1.1754944e-38, %v646_v26 }
 0x1c7   : > { %vm645_vm4 = vcmp.eq.f32.partialorder %v644_v31, 8.507059e+37 }
 0x1c8   : > { %v624_v5 = vadd.f32 %v1193_v59, %v623_v3  ;;  %1072 = vmatmul.msk.bf16.vlgmr.msrb.gmra.mxu2 %vm550_vm1, %v713_v7 }
 0x1c9   : > { %v1195_v9 = vpop.eup %1194 }
 0x1ca   : > { %v1197_v11 = vpop.eup %1196  ;;  %v666_v13 = vmul.f32 %v1195_v9, %v601_v62  ;;  %v1649_v8 = vpop.xlane.xlu2 %597  ;;  %v628_v15 = vsel %vm1644_vm9, %v1193_v59, %v624_v5  ;;  %vm671_vm11 = vweird.f32 %v1195_v9 }
 0x1cb   : > { %v1651_v14 = vpop.xlane.xlu0 %603  ;;  %v636_v17 = vmul.f32 %v1197_v11, %v595_v63  ;;  %1198 = vrcp.f32 %v1649_v8  ;;  %v633_v27 = vsel %vm630_vm10, %v632_v18, %v628_v15  ;;  %vm641_vm12 = vweird.f32 %v1197_v11  ;;  %vm672_vm14 = vmor %vm670_vm13, %vm671_vm11 }
 0x1cc   : > { %v667_v19 = vsub.f32 1.0, %v666_v13  ;;  %1200 = vrcp.f32 %v1651_v14  ;;  %v696_v32 = vmul.f32 %v1611_v16, %v633_v27  ;;  %vm642_vm3 = vmor %vm640_vm15, %vm641_vm12  ;;  %v659_v48 = vand.u32 2147483647, %v1649_v8 }
 0x1cd   : > { %v637_v23 = vsub.f32 1.0, %v636_v17  ;;  %v661_v49 = vand.u32 2147483648, %v1649_v8  ;;  %v691_v52 = vand.u32 2147483648, %v1651_v14  ;;  %v689_v55 = vand.u32 2147483647, %v1651_v14 }
 0x1ce   : > { %v668_v25 = vmul.f32 %v1195_v9, %v667_v19  ;;  %v714_v37 = vpack.c.bf16 %v696_v32, %v696_v32  ;;  %841 = vst.msk [vmem:[%s1640_s11 + $0x8] sm:$0xff] %vm550_vm1, %v696_v32  ;;  %vm655_vm7 = vweird.f32 %v1649_v8  ;;  %vm685_vm9 = vweird.f32 %v1651_v14 }
 0x1cf   : > { %v638_v30 = vmul.f32 %v1197_v11, %v637_v23  ;;  %v662_v56 = vor.u32 1.1754944e-38, %v661_v49  ;;  %vm660_vm10 = vcmp.eq.f32.partialorder %v659_v48, 8.507059e+37  ;;  %v692_v59 = vor.u32 1.1754944e-38, %v691_v52 }
 0x1d0   : > { %v669_v33 = vadd.f32 %v1195_v9, %v668_v25  ;;  %1073 = vmatmul.msk.bf16.vlgmr.msrb.gmra.mxu3 %vm550_vm1, %v714_v37  ;;  %vm690_vm12 = vcmp.eq.f32.partialorder %v689_v55, 8.507059e+37 }
 0x1d1   : > { %v1199_v34 = vpop.eup %1198  ;;  %v639_v36 = vadd.f32 %v1197_v11, %v638_v30 }
 0x1d2   : > { %v1201_v38 = vpop.eup %1200  ;;  %v673_v39 = vsel %vm672_vm14, %v1195_v9, %v669_v33  ;;  %v651_v41 = vmul.f32 %v1199_v34, %v1649_v8  ;;  %vm656_vm5 = vweird.f32 %v1199_v34 }
 0x1d3   : > { %v678_v16 = vsel %vm675_vm2, %v677_v35, %v673_v39  ;;  %v643_v42 = vsel %vm642_vm3, %v1197_v11, %v639_v36  ;;  %v681_v43 = vmul.f32 %v1201_v38, %v1651_v14  ;;  %vm686_vm6 = vweird.f32 %v1201_v38  ;;  %vm657_vm8 = vmor %vm655_vm7, %vm656_vm5 }
 0x1d4   : > { %v699_v44 = vmul.f32 %v1617_v24, %v678_v16  ;;  %v648_v45 = vsel %vm645_vm4, %v647_v40, %v643_v42  ;;  %v652_v46 = vsub.f32 1.0, %v651_v41  ;;  %vm687_vm11 = vmor %vm685_vm9, %vm686_vm6 }
 0x1d5   : > { %v697_v47 = vmul.f32 %v1615_v22, %v648_v45  ;;  %v682_v50 = vsub.f32 1.0, %v681_v43 }
 0x1d6   : > { %844 = vst.msk [vmem:[%s1640_s11 + $0x20] sm:$0xff] %vm550_vm1, %v699_v44  ;;  %v653_v51 = vmul.f32 %v1199_v34, %v652_v46  ;;  %v717_v53 = vpack.c.bf16 %v699_v44, %v699_v44 }
 0x1d7   : > { %v715_v54 = vpack.c.bf16 %v697_v47, %v697_v47  ;;  %842 = vst.msk [vmem:[%s1640_s11 + $0x10] sm:$0xff] %vm550_vm1, %v697_v47  ;;  %v683_v24 = vmul.f32 %v1201_v38, %v682_v50 }
 0x1d8   : > { %v654_v22 = vadd.f32 %v1199_v34, %v653_v51  ;;  %1076 = vmatmul.msk.bf16.vlgmr.msra.gmra.mxu2 %vm550_vm1, %v717_v53 }
 0x1d9   : > { %v684_v57 = vadd.f32 %v1201_v38, %v683_v24  ;;  %1074 = vmatmul.msk.bf16.vlgmr.msra.gmra.mxu0 %vm550_vm1, %v715_v54 }
 0x1da   : > { %v658_v58 = vsel %vm657_vm8, %v1199_v34, %v654_v22 }
 0x1db   : > { %v663_v60 = vsel %vm660_vm10, %v662_v56, %v658_v58  ;;  %v688_v61 = vsel %vm687_vm11, %v1201_v38, %v684_v57 }
 0x1dc   : > { %v698_v62 = vmul.f32 %v1623_v28, %v663_v60  ;;  %v693_v63 = vsel %vm690_vm12, %v692_v59, %v688_v61 }
 0x1dd   : > { %v700_v0 = vmul.f32 %v1625_v29, %v693_v63 }
 0x1de   : > { %v716_v1 = vpack.c.bf16 %v698_v62, %v698_v62  ;;  %843 = vst.msk [vmem:[%s1640_s11 + $0x18] sm:$0xff] %vm550_vm1, %v698_v62 }
 0x1df   : > { %v718_v2 = vpack.c.bf16 %v700_v0, %v700_v0  ;;  %845 = vst.msk [vmem:[%s1640_s11 + $0x28] sm:$0xff] %vm550_vm1, %v700_v0 }
 0x1e0   : > { %1075 = vmatmul.msk.bf16.vlgmr.msra.gmra.mxu1 %vm550_vm1, %v716_v1 }
 0x1e1   : > { %1077 = vmatmul.msk.bf16.vlgmr.msra.gmra.mxu3 %vm550_vm1, %v718_v2 }
 0x1e2   : > { %1319 = shalt.err (!%p1316_p0)
}
 0x1e3   : > { %s1414_s23 = smov 128   ;;  %s1415_s26 = smov 8  }
 0x1e4   : > { %1098 = dma.vmem_to_hbm [thread:$0]  (%p1501_p9), %s884_s29, 768, %s886_s16, %s852_s25, %s1414_s23, %s1414_s23, %s1415_s26  }
 0x1e5   : > { %s362_s24 = scalar_lea.vmem [#allocation8], %s1555_s7  ;;  %s864_s8 = scalar_lea.hbm %s1760_s4, %s1085_s12 }
 0x1e6   : > { %s865_s10 = sshll.u32 %s362_s24, 4  ;;  %s867_s11 = sshll.u32 %s864_s8, 4  ;;  %s866_s10 = int_to_ptr.vmem [resolvable:$true] %s865_s10  ;;  %s868_s11 = int_to_ptr.hbm [resolvable:$true] %s867_s11 }
 0x1e7   : > { %s847_s29 = scalar_lea.sflag [#allocation4], %s1552_s1  ;;  %s1334_s28 = sshra.s32 %s868_s11, 4  ;;  %s1335_s28 = int_to_ptr.hbm [resolvable:$true] %s1334_s28 }
 0x1e8   : > { %s1336_s14 = scalar_lea.hbm %s1335_s28, 48  ;;  %s1340_s12 = scalar_lea.hbm %s1760_s4, 96 }
 0x1e9   : > { %p1337_p1 = scmp.ne.s32.totalorder %s1335_s28, %s1336_s14  ;;  %p1341_p4 = scmp.lt.s32.totalorder %s1335_s28, %s1760_s4 }
 0x1ea   : > { %p1342_p5 = scmp.lt.s32.totalorder %s1340_s12, %s1336_s14 }
 0x1eb   : > { %p1338_p2 = pnand %p1337_p1, %p1501_p9 }
 0x1ec   : > { %p1343_p6 = por %p1342_p5, %p1341_p4 }
 0x1ed   : > { %p1339_p3 = pneg %p1338_p2 }
 0x1ef   : > { %p1344_p7 = pnand %p1343_p6, %p1339_p3 }
 0x24b   : > { %v735_v28 = vpop.f32.mrf.mxu2 }
 0x24c   : > { %834 = vst.msk [vmem:[%s362_s24] sm:$0xff] %vm435_vm0, %v735_v28 }
 0x253   : > { %v737_v29 = vpop.f32.mrf.mxu2  ;;  %v754_v3 = vpop.f32.mrf.mxu3 }
 0x254   : > { %835 = vst.msk [vmem:[%s362_s24 + $0x8] sm:$0xff] %vm435_vm0, %v754_v3 }
 0x256   : > { %v773_v4 = vpop.f32.mrf.mxu0 }
 0x257   : > { %836 = vst.msk [vmem:[%s362_s24 + $0x10] sm:$0xff] %vm435_vm0, %v773_v4 }
 0x25b   : > { %v811_v5 = vpop.f32.mrf.mxu2  ;;  %v756_v7 = vpop.f32.mrf.mxu3 }
 0x25c   : > { %838 = vst.msk [vmem:[%s362_s24 + $0x20] sm:$0xff] %vm435_vm0, %v811_v5 }
 0x25d   : > { %v792_v6 = vpop.f32.mrf.mxu1 }
 0x25e   : > { %v775_v9 = vpop.f32.mrf.mxu0  ;;  %837 = vst.msk [vmem:[%s362_s24 + $0x18] sm:$0xff] %vm435_vm0, %v792_v6 }
 0x263   : > { %v813_v10 = vpop.f32.mrf.mxu2 }
 0x264   : > { %v830_v12 = vpop.f32.mrf.mxu3 }
 0x265   : > { %v794_v11 = vpop.f32.mrf.mxu1  ;;  %839 = vst.msk [vmem:[%s362_s24 + $0x28] sm:$0xff] %vm435_vm0, %v830_v12 }
 0x266   : > { %1347 = shalt.err (!%p1344_p7)
}
 0x267   : > { %1097 = dma.vmem_to_hbm [thread:$0]  (%p1501_p9), %s866_s10, 768, %s868_s11, %s847_s29, %s1414_s23, %s1414_s23, %s1415_s26  }
 0x26c   : > { %v832_v13 = vpop.f32.mrf.mxu3 }
 0x26d PF: > { %s1786_s1 = sld [smem:[#allocation15_spill]]  ;;  %p1112_p8 = pnand %p1061_p12, %p1508_p11 }
 0x26e   : > { %s1788_s17 = sld [smem:[#allocation18_spill]] }
 0x26f   : > { %p1113_p10 = pneg %p1112_p8 }
 0x273   : > { %s900_s27 = sand.u32 1, %s1786_s1  }
 0x274   : > { %s901_s9 = scalar_lea.sflag [#allocation4], %s900_s27 }
 0x275   : > { %1381 = dma.done.wait (%p1113_p10), %s901_s9, 768  }
 0x276   : > { %1383 = vsyncadd (%p1113_p10), %s901_s9, 4294966528  ;;  %s911_s20 = scalar_lea.sflag [#allocation10], %s900_s27 }
 0x277   : > { %1385 = dma.done.wait (%p1113_p10), %s911_s20, 768  }
 0x278   : > { %1387 = vsyncadd (%p1113_p10), %s911_s20, 4294966528  ;;  %s28_s23 = sadd.s32 1, %s1788_s17   ;;  %s1789_s6 = sld [smem:[#allocation16_spill]] }
 0x279   : > { %p25_p13 = scmp.ge.s32.totalorder %s28_s23, 4   ;;  %s1790_s20 = sld [smem:[#allocation20_spill]] }
 0x27a   : > { %s1791_s21 = sld [smem:[#allocation17_spill]]  ;;  %s1793_s18 = smov %s1394_s19 }
 0x27b   : > { %s1792_s22 = sld [smem:[#allocation19_spill]]  ;;  %27 = sbr.rel (!%p25_p13) target bundleno = 12 (0xc), region = 125 }
 0x27e   : > { %s1794_s19 = smov %s1789_s6 }
 0x280   :  { %917 = vsyncpa [#allocation3], 1 }
 0x281   :  { %919 = vsyncpa [#allocation3 + $0x1], 1 }
 0x282   :  { %920 = vsyncpa [#allocation6], 1 }
 0x283   :  { %922 = vsyncpa [#allocation6 + $0x1], 1 }
 0x284   :  { %923 = vsyncpa [#allocation4], 1 }
 0x285   :  { %925 = vsyncpa [#allocation4 + $0x1], 1 }
 0x286   :  { %926 = vsyncpa [#allocation10], 1 }
 0x287   :  { %928 = vsyncpa [#allocation10 + $0x1], 1 }

</bundles_post_ra>
